<compile_context>
chip_gen: v6e
topology: v6e:2x2x1
jax: 0.10.0
libtpu: 0.0.40
codegen_flags: <defaults>
</compile_context>

<pallas_src>
import functools

import jax
import jax.numpy as jnp
from jax.experimental import pallas as pl
from jax.experimental.pallas import tpu as pltpu


# ---------------------------------------------------------------------------
# Fused Pallas kernel: one batch element per grid step, everything in VMEM.
# ---------------------------------------------------------------------------

def _fused_attention_kernel(x_ref, m_ref, mask_ref, w_in_ref, b_in_ref,
                            w_mid_ref, b_mid_ref, w_out_ref, b_out_ref,
                            feat_ref, out_ref, *, H, W, depth, ksize):
    HW = H * W
    x = x_ref[0].astype(jnp.float32)        # (Cin, HW)  spatial on lanes
    m = m_ref[0].astype(jnp.float32)        # (1, HW)

    # sigmoid(map) gate, broadcast over the channel (sublane) axis.
    a = jax.nn.sigmoid(m) * x               # (Cin, HW)

    # conv_in (1x1) == (C, Cin) @ (Cin, HW) matmul.
    h = jnp.dot(w_in_ref[...], a, preferred_element_type=jnp.float32)
    h = h + b_in_ref[...]                   # (C, 1) broadcast over lanes

    # Hoisted constants (loaded once, reused across all mid layers).
    masks = mask_ref[...]                   # (K*K, 1, HW) halo masks
    b_mid = b_mid_ref[...]                  # (depth, C, 1)

    # Static per-tap lane shifts: spatial shift (dh, dw) == lane roll by dh*W+dw.
    r = ksize // 2
    shifts = []
    for kh in range(ksize):
        for kw in range(ksize):
            d = (kh - r) * W + (kw - r)
            shifts.append((-d) % HW)

    # depth x (KxK same conv + ReLU), each as ONE im2col matmul on the MXU.
    for layer in range(depth):
        pieces = []
        for t, s in enumerate(shifts):
            hs = h if s == 0 else pltpu.roll(h, shift=s, axis=1)
            pieces.append(hs * masks[t])            # zero out-of-image halo
        patches = jnp.concatenate(pieces, axis=0)   # (K*K*C, HW)
        h = jnp.dot(w_mid_ref[layer], patches,
                    preferred_element_type=jnp.float32)
        h = jnp.maximum(h + b_mid[layer], 0.0)

    feat_ref[0] = h.astype(feat_ref.dtype)

    # conv_out (1x1 -> 1 channel): weighted sublane reduction (keeps MXU free),
    # then residual add of the (un-gated) resized map.
    o = jnp.sum(h * w_out_ref[...], axis=0, keepdims=True) + b_out_ref[...]
    out_ref[0] = (o + m).astype(out_ref.dtype)


# ---------------------------------------------------------------------------
# Wrapper: layout prep + one pallas_call.
# ---------------------------------------------------------------------------

def _make_tap_masks(H, W, ksize):
    """f32 validity masks for each conv tap (zero where the tap falls off-image)."""
    HW = H * W
    r = ksize // 2
    idx = jnp.arange(HW, dtype=jnp.int32)
    row, col = idx // W, idx % W
    masks = []
    for kh in range(ksize):
        dh = kh - r
        for kw in range(ksize):
            dw = kw - r
            valid = ((row + dh >= 0) & (row + dh < H) &
                     (col + dw >= 0) & (col + dw < W))
            masks.append(valid.astype(jnp.float32).reshape(1, HW))
    return jnp.stack(masks)                 # (K*K, 1, HW)


@functools.partial(jax.jit, static_argnames=("ksize",))
def simple_attention_forward(kparams, x_nchw, map_nchw, *, ksize):
    N, Cin, H, W = x_nchw.shape
    C = kparams["w_in"].shape[0]
    depth = kparams["w_mid"].shape[0]
    HW = H * W

    # TODO(synk): bilinear resize is gather/lerp glue; kept in plain JAX.
    mp = bilinear_resize_nchw(map_nchw, H, W)        # (N, 1, H, W)

    x2 = x_nchw.reshape(N, Cin, HW)                  # free reshape (NCHW row-major)
    m2 = mp.reshape(N, 1, HW)
    masks = _make_tap_masks(H, W, ksize)

    kern = functools.partial(_fused_attention_kernel,
                             H=H, W=W, depth=depth, ksize=ksize)

    feat, out = pl.pallas_call(
        kern,
        out_shape=(jax.ShapeDtypeStruct((N, C, HW), jnp.float32),
                   jax.ShapeDtypeStruct((N, 1, HW), jnp.float32)),
        grid_spec=pl.GridSpec(
            grid=(N,),
            in_specs=[
                pl.BlockSpec((1, Cin, HW), lambda n: (n, 0, 0)),
                pl.BlockSpec((1, 1, HW), lambda n: (n, 0, 0)),
                pl.BlockSpec((ksize * ksize, 1, HW), lambda n: (0, 0, 0)),
                pl.BlockSpec((C, Cin), lambda n: (0, 0)),
                pl.BlockSpec((C, 1), lambda n: (0, 0)),
                pl.BlockSpec((depth, C, ksize * ksize * C), lambda n: (0, 0, 0)),
                pl.BlockSpec((depth, C, 1), lambda n: (0, 0, 0)),
                pl.BlockSpec((C, 1), lambda n: (0, 0)),
                pl.BlockSpec((1, 1), lambda n: (0, 0)),
            ],
            out_specs=(
                pl.BlockSpec((1, C, HW), lambda n: (n, 0, 0)),
                pl.BlockSpec((1, 1, HW), lambda n: (n, 0, 0)),
            ),
        ),
        compiler_params=pltpu.CompilerParams(dimension_semantics=("parallel",)),
    )(x2, m2, masks, kparams["w_in"], kparams["b_in"], kparams["w_mid"],
      kparams["b_mid"], kparams["w_out"], kparams["b_out"])

    return feat.reshape(N, C, H, W), out.reshape(N, 1, H, W)


# ---------------------------------------------------------------------------
# Glue: bilinear interpolation matching F.interpolate(mode='bilinear',
# align_corners=False). Pure gather/lerp -- plain JAX.
# ---------------------------------------------------------------------------

def bilinear_resize_nchw(x, out_h, out_w):
    N, C, in_h, in_w = x.shape
    if (in_h, in_w) == (out_h, out_w):
        return x

    def src_index(out_size, in_size):
        scale = in_size / out_size
        i = jnp.arange(out_size, dtype=jnp.float32)
        s = jnp.maximum((i + 0.5) * scale - 0.5, 0.0)   # PyTorch clamps src >= 0
        i0 = jnp.minimum(jnp.floor(s).astype(jnp.int32), in_size - 1)
        i1 = jnp.minimum(i0 + 1, in_size - 1)
        w1 = jnp.clip(s - i0.astype(jnp.float32), 0.0, 1.0)
        return i0, i1, w1

    y0, y1, wy = src_index(out_h, in_h)
    x0, x1, wx = src_index(out_w, in_w)
    top = x[:, :, y0, :]
    bot = x[:, :, y1, :]
    rows = top * (1.0 - wy)[None, None, :, None] + bot * wy[None, None, :, None]
    left = rows[:, :, :, x0]
    right = rows[:, :, :, x1]
    return left * (1.0 - wx)[None, None, None, :] + right * wx[None, None, None, :]


# ---------------------------------------------------------------------------
# Parameters (deterministic, synthetic).
# ---------------------------------------------------------------------------

def init_params(key, in_channel, channel, depth=3, kernel_size=3):
    # conv(cin, cout, k): plain Conv2d, padding=k//2, with bias.
    assert kernel_size % 2 == 1, "padding=k//2 only matches SAME for odd k"
    keys = jax.random.split(key, 2 * (depth + 2))

    def conv_init(cout, cin, k, k1, k2):
        fan_in = cin * k * k
        w = jax.random.normal(k1, (cout, cin, k, k), jnp.float32) / jnp.sqrt(fan_in)
        b = 0.01 * jax.random.normal(k2, (cout,), jnp.float32)
        return w, b

    w_in, b_in = conv_init(channel, in_channel, 1, keys[0], keys[1])
    w_mid, b_mid = [], []
    for i in range(depth):
        w, b = conv_init(channel, channel, kernel_size,
                         keys[2 + 2 * i], keys[3 + 2 * i])
        w_mid.append(w)
        b_mid.append(b)
    w_out, b_out = conv_init(1, channel, 1, keys[-2], keys[-1])
    return {"w_in": w_in, "b_in": b_in, "w_mid": w_mid, "b_mid": b_mid,
            "w_out": w_out, "b_out": b_out}


def to_kernel_params(p, kernel_size):
    """OIHW params -> fused-kernel layout: (Cout, K*K*Cin) matching im2col order."""
    C, Cin = p["w_in"].shape[:2]
    K = kernel_size
    w_mid = jnp.stack([w.transpose(0, 2, 3, 1).reshape(C, K * K * C)  # (co,kh,kw,ci)
                       for w in p["w_mid"]])
    b_mid = jnp.stack([b.reshape(C, 1) for b in p["b_mid"]])
    return {
        "w_in": p["w_in"].reshape(C, Cin),
        "b_in": p["b_in"].reshape(C, 1),
        "w_mid": w_mid,                      # (depth, C, K*K*C)
        "b_mid": b_mid,                      # (depth, C, 1)
        "w_out": p["w_out"].reshape(C, 1),   # used as a sublane-weighted reduction
        "b_out": p["b_out"].reshape(1, 1),
    }


# ---------------------------------------------------------------------------
# Pure-JAX reference (correctness check).
# ---------------------------------------------------------------------------

def reference_forward(params, x_nchw, map_nchw):
    H, W = x_nchw.shape[-2:]
    mp = bilinear_resize_nchw(map_nchw, H, W)

    def conv(x, w, b, relu=False):
        y = jax.lax.conv_general_dilated(
            x, w, (1, 1), "SAME", dimension_numbers=("NCHW", "OIHW", "NCHW"))
        y = y + b.reshape(1, -1, 1, 1)
        return jnp.maximum(y, 0.0) if relu else y

    a = jax.nn.sigmoid(mp) * x_nchw
    h = conv(a, params["w_in"], params["b_in"])
    for w, b in zip(params["w_mid"], params["b_mid"]):
        h = conv(h, w, b, relu=True)
    out = conv(h, params["w_out"], params["b_out"]) + mp
    return h, out


# ---------------------------------------------------------------------------

if __name__ == "__main__":
    key = jax.random.PRNGKey(0)
    kx, km, kp = jax.random.split(key, 3)

    N, Cin, H, W = 2, 4, 16, 16
    channel, depth, ksize = 8, 3, 3

    x = jax.random.normal(kx, (N, Cin, H, W), jnp.float32)
    sal_map = jax.random.normal(km, (N, 1, 8, 8), jnp.float32)   # lower-res map
    params = init_params(kp, Cin, channel, depth, ksize)
    kparams = to_kernel_params(params, ksize)

    feat, out = simple_attention_forward(kparams, x, sal_map, ksize=ksize)
    feat, out = jax.block_until_ready((feat, out))

    feat_ref, out_ref = reference_forward(params, x, sal_map)
    assert feat.shape == (N, channel, H, W) and out.shape == (N, 1, H, W)
    assert jnp.allclose(feat, feat_ref, atol=1e-3, rtol=1e-3)
    assert jnp.allclose(out, out_ref, atol=1e-3, rtol=1e-3)

    print("KERNEL_OK")
</pallas_src>

<mosaic_0001>
module attributes {stable_mosaic.version = 11 : i64} {
  func.func @_fused_attention_kernel(%arg0: i32, %arg1: memref<1x4x256xf32, #tpu.memory_space<vmem>>, %arg2: memref<1x1x256xf32, #tpu.memory_space<vmem>>, %arg3: memref<9x1x256xf32, #tpu.memory_space<vmem>>, %arg4: memref<8x4xf32, #tpu.memory_space<vmem>>, %arg5: memref<8x1xf32, #tpu.memory_space<vmem>>, %arg6: memref<3x8x72xf32, #tpu.memory_space<vmem>>, %arg7: memref<3x8x1xf32, #tpu.memory_space<vmem>>, %arg8: memref<8x1xf32, #tpu.memory_space<vmem>>, %arg9: memref<1x1xf32, #tpu.memory_space<vmem>>, %arg10: memref<1x8x256xf32, #tpu.memory_space<vmem>>, %arg11: memref<1x1x256xf32, #tpu.memory_space<vmem>>) attributes {dimension_semantics = [#tpu.dimension_semantics<parallel>], iteration_bounds = array<i64: 2>, scalar_prefetch = 0 : i64, scratch_operands = 0 : i64, tpu.core_type = #tpu.core_type<tc>, window_params = [{transform_indices = @transform_0, window_bounds = array<i64: 1, 4, 256>}, {transform_indices = @transform_1, window_bounds = array<i64: 1, 1, 256>}, {pipeline_mode = #tpu.pipeline_mode<synchronous>, transform_indices = @transform_2, window_bounds = array<i64: 9, 1, 256>}, {pipeline_mode = #tpu.pipeline_mode<synchronous>, transform_indices = @transform_3, window_bounds = array<i64: 8, 4>}, {pipeline_mode = #tpu.pipeline_mode<synchronous>, transform_indices = @transform_4, window_bounds = array<i64: 8, 1>}, {pipeline_mode = #tpu.pipeline_mode<synchronous>, transform_indices = @transform_5, window_bounds = array<i64: 3, 8, 72>}, {pipeline_mode = #tpu.pipeline_mode<synchronous>, transform_indices = @transform_6, window_bounds = array<i64: 3, 8, 1>}, {pipeline_mode = #tpu.pipeline_mode<synchronous>, transform_indices = @transform_7, window_bounds = array<i64: 8, 1>}, {pipeline_mode = #tpu.pipeline_mode<synchronous>, transform_indices = @transform_8, window_bounds = array<i64: 1, 1>}, {transform_indices = @transform_9, window_bounds = array<i64: 1, 8, 256>}, {transform_indices = @transform_10, window_bounds = array<i64: 1, 1, 256>}]} {
    %c0 = arith.constant 0 : index
    %c0_0 = arith.constant 0 : index
    %c0_1 = arith.constant 0 : index
    %0 = vector.load %arg1[%c0, %c0_0, %c0_1] : memref<1x4x256xf32, #tpu.memory_space<vmem>>, vector<1x4x256xf32>
    %1 = vector.shape_cast %0 : vector<1x4x256xf32> to vector<4x256xf32>
    %c0_2 = arith.constant 0 : index
    %c0_3 = arith.constant 0 : index
    %c0_4 = arith.constant 0 : index
    %2 = vector.load %arg2[%c0_2, %c0_3, %c0_4] : memref<1x1x256xf32, #tpu.memory_space<vmem>>, vector<1x1x256xf32>
    %3 = vector.shape_cast %2 : vector<1x1x256xf32> to vector<1x256xf32>
    %4 = arith.negf %3 : vector<1x256xf32>
    %5 = math.exp %4 : vector<1x256xf32>
    %cst = arith.constant 1.000000e+00 : f32
    %6 = vector.broadcast %cst : f32 to vector<1x256xf32>
    %7 = arith.addf %6, %5 : vector<1x256xf32>
    %8 = arith.divf %6, %7 : vector<1x256xf32>
    %9 = vector.broadcast %8 : vector<1x256xf32> to vector<4x256xf32>
    %10 = arith.mulf %9, %1 : vector<4x256xf32>
    %c0_5 = arith.constant 0 : index
    %c0_6 = arith.constant 0 : index
    %11 = vector.load %arg4[%c0_5, %c0_6] : memref<8x4xf32, #tpu.memory_space<vmem>>, vector<8x4xf32>
    %cst_7 = arith.constant dense<0.000000e+00> : vector<8x256xf32>
    %12 = tpu.matmul %11, %10, %cst_7 {dimension_numbers = #tpu.dot_dimension_numbers<[1], [0], [0], [1], [0, 0, 1, 1], [], []>} : vector<8x4xf32>, vector<4x256xf32>, vector<8x256xf32> -> vector<8x256xf32>
    %c0_8 = arith.constant 0 : index
    %c0_9 = arith.constant 0 : index
    %13 = vector.load %arg5[%c0_8, %c0_9] : memref<8x1xf32, #tpu.memory_space<vmem>>, vector<8x1xf32>
    %14 = vector.broadcast %13 : vector<8x1xf32> to vector<8x256xf32>
    %15 = arith.addf %12, %14 : vector<8x256xf32>
    %c0_10 = arith.constant 0 : index
    %c0_11 = arith.constant 0 : index
    %c0_12 = arith.constant 0 : index
    %16 = vector.load %arg3[%c0_10, %c0_11, %c0_12] : memref<9x1x256xf32, #tpu.memory_space<vmem>>, vector<9x1x256xf32>
    %c0_13 = arith.constant 0 : index
    %c0_14 = arith.constant 0 : index
    %c0_15 = arith.constant 0 : index
    %17 = vector.load %arg7[%c0_13, %c0_14, %c0_15] : memref<3x8x1xf32, #tpu.memory_space<vmem>>, vector<3x8x1xf32>
    %c17_i32 = arith.constant 17 : i32
    %18 = tpu.dynamic_rotate %15 by %c17_i32 dim 1 : vector<8x256xf32>, i32 -> vector<8x256xf32>
    %19 = vector.extract_strided_slice %16 {offsets = [0, 0, 0], sizes = [1, 1, 256], strides = [1, 1, 1]} : vector<9x1x256xf32> to vector<1x1x256xf32>
    %20 = vector.shape_cast %19 : vector<1x1x256xf32> to vector<1x256xf32>
    %21 = vector.broadcast %20 : vector<1x256xf32> to vector<8x256xf32>
    %22 = arith.mulf %18, %21 : vector<8x256xf32>
    %c16_i32 = arith.constant 16 : i32
    %23 = tpu.dynamic_rotate %15 by %c16_i32 dim 1 : vector<8x256xf32>, i32 -> vector<8x256xf32>
    %24 = vector.extract_strided_slice %16 {offsets = [1, 0, 0], sizes = [1, 1, 256], strides = [1, 1, 1]} : vector<9x1x256xf32> to vector<1x1x256xf32>
    %25 = vector.shape_cast %24 : vector<1x1x256xf32> to vector<1x256xf32>
    %26 = vector.broadcast %25 : vector<1x256xf32> to vector<8x256xf32>
    %27 = arith.mulf %23, %26 : vector<8x256xf32>
    %c15_i32 = arith.constant 15 : i32
    %28 = tpu.dynamic_rotate %15 by %c15_i32 dim 1 : vector<8x256xf32>, i32 -> vector<8x256xf32>
    %29 = vector.extract_strided_slice %16 {offsets = [2, 0, 0], sizes = [1, 1, 256], strides = [1, 1, 1]} : vector<9x1x256xf32> to vector<1x1x256xf32>
    %30 = vector.shape_cast %29 : vector<1x1x256xf32> to vector<1x256xf32>
    %31 = vector.broadcast %30 : vector<1x256xf32> to vector<8x256xf32>
    %32 = arith.mulf %28, %31 : vector<8x256xf32>
    %c1_i32 = arith.constant 1 : i32
    %33 = tpu.dynamic_rotate %15 by %c1_i32 dim 1 : vector<8x256xf32>, i32 -> vector<8x256xf32>
    %34 = vector.extract_strided_slice %16 {offsets = [3, 0, 0], sizes = [1, 1, 256], strides = [1, 1, 1]} : vector<9x1x256xf32> to vector<1x1x256xf32>
    %35 = vector.shape_cast %34 : vector<1x1x256xf32> to vector<1x256xf32>
    %36 = vector.broadcast %35 : vector<1x256xf32> to vector<8x256xf32>
    %37 = arith.mulf %33, %36 : vector<8x256xf32>
    %38 = vector.extract_strided_slice %16 {offsets = [4, 0, 0], sizes = [1, 1, 256], strides = [1, 1, 1]} : vector<9x1x256xf32> to vector<1x1x256xf32>
    %39 = vector.shape_cast %38 : vector<1x1x256xf32> to vector<1x256xf32>
    %40 = vector.broadcast %39 : vector<1x256xf32> to vector<8x256xf32>
    %41 = arith.mulf %15, %40 : vector<8x256xf32>
    %c255_i32 = arith.constant 255 : i32
    %42 = tpu.dynamic_rotate %15 by %c255_i32 dim 1 : vector<8x256xf32>, i32 -> vector<8x256xf32>
    %43 = vector.extract_strided_slice %16 {offsets = [5, 0, 0], sizes = [1, 1, 256], strides = [1, 1, 1]} : vector<9x1x256xf32> to vector<1x1x256xf32>
    %44 = vector.shape_cast %43 : vector<1x1x256xf32> to vector<1x256xf32>
    %45 = vector.broadcast %44 : vector<1x256xf32> to vector<8x256xf32>
    %46 = arith.mulf %42, %45 : vector<8x256xf32>
    %c241_i32 = arith.constant 241 : i32
    %47 = tpu.dynamic_rotate %15 by %c241_i32 dim 1 : vector<8x256xf32>, i32 -> vector<8x256xf32>
    %48 = vector.extract_strided_slice %16 {offsets = [6, 0, 0], sizes = [1, 1, 256], strides = [1, 1, 1]} : vector<9x1x256xf32> to vector<1x1x256xf32>
    %49 = vector.shape_cast %48 : vector<1x1x256xf32> to vector<1x256xf32>
    %50 = vector.broadcast %49 : vector<1x256xf32> to vector<8x256xf32>
    %51 = arith.mulf %47, %50 : vector<8x256xf32>
    %c240_i32 = arith.constant 240 : i32
    %52 = tpu.dynamic_rotate %15 by %c240_i32 dim 1 : vector<8x256xf32>, i32 -> vector<8x256xf32>
    %53 = vector.extract_strided_slice %16 {offsets = [7, 0, 0], sizes = [1, 1, 256], strides = [1, 1, 1]} : vector<9x1x256xf32> to vector<1x1x256xf32>
    %54 = vector.shape_cast %53 : vector<1x1x256xf32> to vector<1x256xf32>
    %55 = vector.broadcast %54 : vector<1x256xf32> to vector<8x256xf32>
    %56 = arith.mulf %52, %55 : vector<8x256xf32>
    %c239_i32 = arith.constant 239 : i32
    %57 = tpu.dynamic_rotate %15 by %c239_i32 dim 1 : vector<8x256xf32>, i32 -> vector<8x256xf32>
    %58 = vector.extract_strided_slice %16 {offsets = [8, 0, 0], sizes = [1, 1, 256], strides = [1, 1, 1]} : vector<9x1x256xf32> to vector<1x1x256xf32>
    %59 = vector.shape_cast %58 : vector<1x1x256xf32> to vector<1x256xf32>
    %60 = vector.broadcast %59 : vector<1x256xf32> to vector<8x256xf32>
    %61 = arith.mulf %57, %60 : vector<8x256xf32>
    %62 = tpu.concatenate %22, %27, %32, %37, %41, %46, %51, %56, %61 in 0 : vector<8x256xf32>, vector<8x256xf32>, vector<8x256xf32>, vector<8x256xf32>, vector<8x256xf32>, vector<8x256xf32>, vector<8x256xf32>, vector<8x256xf32>, vector<8x256xf32> -> vector<72x256xf32>
    %c0_16 = arith.constant 0 : index
    %c0_17 = arith.constant 0 : index
    %c0_18 = arith.constant 0 : index
    %63 = vector.load %arg6[%c0_16, %c0_17, %c0_18] : memref<3x8x72xf32, #tpu.memory_space<vmem>>, vector<1x8x72xf32>
    %64 = vector.shape_cast %63 : vector<1x8x72xf32> to vector<8x72xf32>
    %cst_19 = arith.constant dense<0.000000e+00> : vector<8x256xf32>
    %65 = tpu.matmul %64, %62, %cst_19 {dimension_numbers = #tpu.dot_dimension_numbers<[1], [0], [0], [1], [0, 0, 1, 1], [], []>} : vector<8x72xf32>, vector<72x256xf32>, vector<8x256xf32> -> vector<8x256xf32>
    %66 = vector.extract_strided_slice %17 {offsets = [0, 0, 0], sizes = [1, 8, 1], strides = [1, 1, 1]} : vector<3x8x1xf32> to vector<1x8x1xf32>
    %67 = vector.shape_cast %66 : vector<1x8x1xf32> to vector<8x1xf32>
    %68 = vector.broadcast %67 : vector<8x1xf32> to vector<8x256xf32>
    %69 = arith.addf %65, %68 : vector<8x256xf32>
    %cst_20 = arith.constant 0.000000e+00 : f32
    %70 = vector.broadcast %cst_20 : f32 to vector<8x256xf32>
    %71 = arith.maximumf %69, %70 : vector<8x256xf32>
    %c17_i32_21 = arith.constant 17 : i32
    %72 = tpu.dynamic_rotate %71 by %c17_i32_21 dim 1 : vector<8x256xf32>, i32 -> vector<8x256xf32>
    %73 = vector.extract_strided_slice %16 {offsets = [0, 0, 0], sizes = [1, 1, 256], strides = [1, 1, 1]} : vector<9x1x256xf32> to vector<1x1x256xf32>
    %74 = vector.shape_cast %73 : vector<1x1x256xf32> to vector<1x256xf32>
    %75 = vector.broadcast %74 : vector<1x256xf32> to vector<8x256xf32>
    %76 = arith.mulf %72, %75 : vector<8x256xf32>
    %c16_i32_22 = arith.constant 16 : i32
    %77 = tpu.dynamic_rotate %71 by %c16_i32_22 dim 1 : vector<8x256xf32>, i32 -> vector<8x256xf32>
    %78 = vector.extract_strided_slice %16 {offsets = [1, 0, 0], sizes = [1, 1, 256], strides = [1, 1, 1]} : vector<9x1x256xf32> to vector<1x1x256xf32>
    %79 = vector.shape_cast %78 : vector<1x1x256xf32> to vector<1x256xf32>
    %80 = vector.broadcast %79 : vector<1x256xf32> to vector<8x256xf32>
    %81 = arith.mulf %77, %80 : vector<8x256xf32>
    %c15_i32_23 = arith.constant 15 : i32
    %82 = tpu.dynamic_rotate %71 by %c15_i32_23 dim 1 : vector<8x256xf32>, i32 -> vector<8x256xf32>
    %83 = vector.extract_strided_slice %16 {offsets = [2, 0, 0], sizes = [1, 1, 256], strides = [1, 1, 1]} : vector<9x1x256xf32> to vector<1x1x256xf32>
    %84 = vector.shape_cast %83 : vector<1x1x256xf32> to vector<1x256xf32>
    %85 = vector.broadcast %84 : vector<1x256xf32> to vector<8x256xf32>
    %86 = arith.mulf %82, %85 : vector<8x256xf32>
    %c1_i32_24 = arith.constant 1 : i32
    %87 = tpu.dynamic_rotate %71 by %c1_i32_24 dim 1 : vector<8x256xf32>, i32 -> vector<8x256xf32>
    %88 = vector.extract_strided_slice %16 {offsets = [3, 0, 0], sizes = [1, 1, 256], strides = [1, 1, 1]} : vector<9x1x256xf32> to vector<1x1x256xf32>
    %89 = vector.shape_cast %88 : vector<1x1x256xf32> to vector<1x256xf32>
    %90 = vector.broadcast %89 : vector<1x256xf32> to vector<8x256xf32>
    %91 = arith.mulf %87, %90 : vector<8x256xf32>
    %92 = vector.extract_strided_slice %16 {offsets = [4, 0, 0], sizes = [1, 1, 256], strides = [1, 1, 1]} : vector<9x1x256xf32> to vector<1x1x256xf32>
    %93 = vector.shape_cast %92 : vector<1x1x256xf32> to vector<1x256xf32>
    %94 = vector.broadcast %93 : vector<1x256xf32> to vector<8x256xf32>
    %95 = arith.mulf %71, %94 : vector<8x256xf32>
    %c255_i32_25 = arith.constant 255 : i32
    %96 = tpu.dynamic_rotate %71 by %c255_i32_25 dim 1 : vector<8x256xf32>, i32 -> vector<8x256xf32>
    %97 = vector.extract_strided_slice %16 {offsets = [5, 0, 0], sizes = [1, 1, 256], strides = [1, 1, 1]} : vector<9x1x256xf32> to vector<1x1x256xf32>
    %98 = vector.shape_cast %97 : vector<1x1x256xf32> to vector<1x256xf32>
    %99 = vector.broadcast %98 : vector<1x256xf32> to vector<8x256xf32>
    %100 = arith.mulf %96, %99 : vector<8x256xf32>
    %c241_i32_26 = arith.constant 241 : i32
    %101 = tpu.dynamic_rotate %71 by %c241_i32_26 dim 1 : vector<8x256xf32>, i32 -> vector<8x256xf32>
    %102 = vector.extract_strided_slice %16 {offsets = [6, 0, 0], sizes = [1, 1, 256], strides = [1, 1, 1]} : vector<9x1x256xf32> to vector<1x1x256xf32>
    %103 = vector.shape_cast %102 : vector<1x1x256xf32> to vector<1x256xf32>
    %104 = vector.broadcast %103 : vector<1x256xf32> to vector<8x256xf32>
    %105 = arith.mulf %101, %104 : vector<8x256xf32>
    %c240_i32_27 = arith.constant 240 : i32
    %106 = tpu.dynamic_rotate %71 by %c240_i32_27 dim 1 : vector<8x256xf32>, i32 -> vector<8x256xf32>
    %107 = vector.extract_strided_slice %16 {offsets = [7, 0, 0], sizes = [1, 1, 256], strides = [1, 1, 1]} : vector<9x1x256xf32> to vector<1x1x256xf32>
    %108 = vector.shape_cast %107 : vector<1x1x256xf32> to vector<1x256xf32>
    %109 = vector.broadcast %108 : vector<1x256xf32> to vector<8x256xf32>
    %110 = arith.mulf %106, %109 : vector<8x256xf32>
    %c239_i32_28 = arith.constant 239 : i32
    %111 = tpu.dynamic_rotate %71 by %c239_i32_28 dim 1 : vector<8x256xf32>, i32 -> vector<8x256xf32>
    %112 = vector.extract_strided_slice %16 {offsets = [8, 0, 0], sizes = [1, 1, 256], strides = [1, 1, 1]} : vector<9x1x256xf32> to vector<1x1x256xf32>
    %113 = vector.shape_cast %112 : vector<1x1x256xf32> to vector<1x256xf32>
    %114 = vector.broadcast %113 : vector<1x256xf32> to vector<8x256xf32>
    %115 = arith.mulf %111, %114 : vector<8x256xf32>
    %116 = tpu.concatenate %76, %81, %86, %91, %95, %100, %105, %110, %115 in 0 : vector<8x256xf32>, vector<8x256xf32>, vector<8x256xf32>, vector<8x256xf32>, vector<8x256xf32>, vector<8x256xf32>, vector<8x256xf32>, vector<8x256xf32>, vector<8x256xf32> -> vector<72x256xf32>
    %c1 = arith.constant 1 : index
    %c0_29 = arith.constant 0 : index
    %c0_30 = arith.constant 0 : index
    %117 = vector.load %arg6[%c1, %c0_29, %c0_30] : memref<3x8x72xf32, #tpu.memory_space<vmem>>, vector<1x8x72xf32>
    %118 = vector.shape_cast %117 : vector<1x8x72xf32> to vector<8x72xf32>
    %cst_31 = arith.constant dense<0.000000e+00> : vector<8x256xf32>
    %119 = tpu.matmul %118, %116, %cst_31 {dimension_numbers = #tpu.dot_dimension_numbers<[1], [0], [0], [1], [0, 0, 1, 1], [], []>} : vector<8x72xf32>, vector<72x256xf32>, vector<8x256xf32> -> vector<8x256xf32>
    %120 = vector.extract_strided_slice %17 {offsets = [1, 0, 0], sizes = [1, 8, 1], strides = [1, 1, 1]} : vector<3x8x1xf32> to vector<1x8x1xf32>
    %121 = vector.shape_cast %120 : vector<1x8x1xf32> to vector<8x1xf32>
    %122 = vector.broadcast %121 : vector<8x1xf32> to vector<8x256xf32>
    %123 = arith.addf %119, %122 : vector<8x256xf32>
    %cst_32 = arith.constant 0.000000e+00 : f32
    %124 = vector.broadcast %cst_32 : f32 to vector<8x256xf32>
    %125 = arith.maximumf %123, %124 : vector<8x256xf32>
    %c17_i32_33 = arith.constant 17 : i32
    %126 = tpu.dynamic_rotate %125 by %c17_i32_33 dim 1 : vector<8x256xf32>, i32 -> vector<8x256xf32>
    %127 = vector.extract_strided_slice %16 {offsets = [0, 0, 0], sizes = [1, 1, 256], strides = [1, 1, 1]} : vector<9x1x256xf32> to vector<1x1x256xf32>
    %128 = vector.shape_cast %127 : vector<1x1x256xf32> to vector<1x256xf32>
    %129 = vector.broadcast %128 : vector<1x256xf32> to vector<8x256xf32>
    %130 = arith.mulf %126, %129 : vector<8x256xf32>
    %c16_i32_34 = arith.constant 16 : i32
    %131 = tpu.dynamic_rotate %125 by %c16_i32_34 dim 1 : vector<8x256xf32>, i32 -> vector<8x256xf32>
    %132 = vector.extract_strided_slice %16 {offsets = [1, 0, 0], sizes = [1, 1, 256], strides = [1, 1, 1]} : vector<9x1x256xf32> to vector<1x1x256xf32>
    %133 = vector.shape_cast %132 : vector<1x1x256xf32> to vector<1x256xf32>
    %134 = vector.broadcast %133 : vector<1x256xf32> to vector<8x256xf32>
    %135 = arith.mulf %131, %134 : vector<8x256xf32>
    %c15_i32_35 = arith.constant 15 : i32
    %136 = tpu.dynamic_rotate %125 by %c15_i32_35 dim 1 : vector<8x256xf32>, i32 -> vector<8x256xf32>
    %137 = vector.extract_strided_slice %16 {offsets = [2, 0, 0], sizes = [1, 1, 256], strides = [1, 1, 1]} : vector<9x1x256xf32> to vector<1x1x256xf32>
    %138 = vector.shape_cast %137 : vector<1x1x256xf32> to vector<1x256xf32>
    %139 = vector.broadcast %138 : vector<1x256xf32> to vector<8x256xf32>
    %140 = arith.mulf %136, %139 : vector<8x256xf32>
    %c1_i32_36 = arith.constant 1 : i32
    %141 = tpu.dynamic_rotate %125 by %c1_i32_36 dim 1 : vector<8x256xf32>, i32 -> vector<8x256xf32>
    %142 = vector.extract_strided_slice %16 {offsets = [3, 0, 0], sizes = [1, 1, 256], strides = [1, 1, 1]} : vector<9x1x256xf32> to vector<1x1x256xf32>
    %143 = vector.shape_cast %142 : vector<1x1x256xf32> to vector<1x256xf32>
    %144 = vector.broadcast %143 : vector<1x256xf32> to vector<8x256xf32>
    %145 = arith.mulf %141, %144 : vector<8x256xf32>
    %146 = vector.extract_strided_slice %16 {offsets = [4, 0, 0], sizes = [1, 1, 256], strides = [1, 1, 1]} : vector<9x1x256xf32> to vector<1x1x256xf32>
    %147 = vector.shape_cast %146 : vector<1x1x256xf32> to vector<1x256xf32>
    %148 = vector.broadcast %147 : vector<1x256xf32> to vector<8x256xf32>
    %149 = arith.mulf %125, %148 : vector<8x256xf32>
    %c255_i32_37 = arith.constant 255 : i32
    %150 = tpu.dynamic_rotate %125 by %c255_i32_37 dim 1 : vector<8x256xf32>, i32 -> vector<8x256xf32>
    %151 = vector.extract_strided_slice %16 {offsets = [5, 0, 0], sizes = [1, 1, 256], strides = [1, 1, 1]} : vector<9x1x256xf32> to vector<1x1x256xf32>
    %152 = vector.shape_cast %151 : vector<1x1x256xf32> to vector<1x256xf32>
    %153 = vector.broadcast %152 : vector<1x256xf32> to vector<8x256xf32>
    %154 = arith.mulf %150, %153 : vector<8x256xf32>
    %c241_i32_38 = arith.constant 241 : i32
    %155 = tpu.dynamic_rotate %125 by %c241_i32_38 dim 1 : vector<8x256xf32>, i32 -> vector<8x256xf32>
    %156 = vector.extract_strided_slice %16 {offsets = [6, 0, 0], sizes = [1, 1, 256], strides = [1, 1, 1]} : vector<9x1x256xf32> to vector<1x1x256xf32>
    %157 = vector.shape_cast %156 : vector<1x1x256xf32> to vector<1x256xf32>
    %158 = vector.broadcast %157 : vector<1x256xf32> to vector<8x256xf32>
    %159 = arith.mulf %155, %158 : vector<8x256xf32>
    %c240_i32_39 = arith.constant 240 : i32
    %160 = tpu.dynamic_rotate %125 by %c240_i32_39 dim 1 : vector<8x256xf32>, i32 -> vector<8x256xf32>
    %161 = vector.extract_strided_slice %16 {offsets = [7, 0, 0], sizes = [1, 1, 256], strides = [1, 1, 1]} : vector<9x1x256xf32> to vector<1x1x256xf32>
    %162 = vector.shape_cast %161 : vector<1x1x256xf32> to vector<1x256xf32>
    %163 = vector.broadcast %162 : vector<1x256xf32> to vector<8x256xf32>
    %164 = arith.mulf %160, %163 : vector<8x256xf32>
    %c239_i32_40 = arith.constant 239 : i32
    %165 = tpu.dynamic_rotate %125 by %c239_i32_40 dim 1 : vector<8x256xf32>, i32 -> vector<8x256xf32>
    %166 = vector.extract_strided_slice %16 {offsets = [8, 0, 0], sizes = [1, 1, 256], strides = [1, 1, 1]} : vector<9x1x256xf32> to vector<1x1x256xf32>
    %167 = vector.shape_cast %166 : vector<1x1x256xf32> to vector<1x256xf32>
    %168 = vector.broadcast %167 : vector<1x256xf32> to vector<8x256xf32>
    %169 = arith.mulf %165, %168 : vector<8x256xf32>
    %170 = tpu.concatenate %130, %135, %140, %145, %149, %154, %159, %164, %169 in 0 : vector<8x256xf32>, vector<8x256xf32>, vector<8x256xf32>, vector<8x256xf32>, vector<8x256xf32>, vector<8x256xf32>, vector<8x256xf32>, vector<8x256xf32>, vector<8x256xf32> -> vector<72x256xf32>
    %c2 = arith.constant 2 : index
    %c0_41 = arith.constant 0 : index
    %c0_42 = arith.constant 0 : index
    %171 = vector.load %arg6[%c2, %c0_41, %c0_42] : memref<3x8x72xf32, #tpu.memory_space<vmem>>, vector<1x8x72xf32>
    %172 = vector.shape_cast %171 : vector<1x8x72xf32> to vector<8x72xf32>
    %cst_43 = arith.constant dense<0.000000e+00> : vector<8x256xf32>
    %173 = tpu.matmul %172, %170, %cst_43 {dimension_numbers = #tpu.dot_dimension_numbers<[1], [0], [0], [1], [0, 0, 1, 1], [], []>} : vector<8x72xf32>, vector<72x256xf32>, vector<8x256xf32> -> vector<8x256xf32>
    %174 = vector.extract_strided_slice %17 {offsets = [2, 0, 0], sizes = [1, 8, 1], strides = [1, 1, 1]} : vector<3x8x1xf32> to vector<1x8x1xf32>
    %175 = vector.shape_cast %174 : vector<1x8x1xf32> to vector<8x1xf32>
    %176 = vector.broadcast %175 : vector<8x1xf32> to vector<8x256xf32>
    %177 = arith.addf %173, %176 : vector<8x256xf32>
    %cst_44 = arith.constant 0.000000e+00 : f32
    %178 = vector.broadcast %cst_44 : f32 to vector<8x256xf32>
    %179 = arith.maximumf %177, %178 : vector<8x256xf32>
    %c0_45 = arith.constant 0 : index
    %c0_46 = arith.constant 0 : index
    %c0_47 = arith.constant 0 : index
    %180 = vector.load %arg10[%c0_45, %c0_46, %c0_47] : memref<1x8x256xf32, #tpu.memory_space<vmem>>, vector<1x8x256xf32>
    %181 = vector.shape_cast %180 : vector<1x8x256xf32> to vector<8x256xf32>
    %182 = vector.shape_cast %179 : vector<8x256xf32> to vector<1x8x256xf32>
    tpu.vector_store %arg10[%c0_45, %c0_46, %c0_47], %182 {strides = array<i32>} : memref<1x8x256xf32, #tpu.memory_space<vmem>>, vector<1x8x256xf32>,
    %c0_48 = arith.constant 0 : index
    %c0_49 = arith.constant 0 : index
    %183 = vector.load %arg8[%c0_48, %c0_49] : memref<8x1xf32, #tpu.memory_space<vmem>>, vector<8x1xf32>
    %184 = vector.broadcast %183 : vector<8x1xf32> to vector<8x256xf32>
    %185 = arith.mulf %179, %184 : vector<8x256xf32>
    %cst_50 = arith.constant dense<0.000000e+00> : vector<256xf32>
    %186 = vector.multi_reduction <add>, %185, %cst_50 [0] : vector<8x256xf32> to vector<256xf32>
    %187 = vector.shape_cast %186 : vector<256xf32> to vector<1x256xf32>
    %c0_51 = arith.constant 0 : index
    %c0_52 = arith.constant 0 : index
    %188 = vector.load %arg9[%c0_51, %c0_52] : memref<1x1xf32, #tpu.memory_space<vmem>>, vector<1x1xf32>
    %189 = vector.broadcast %188 : vector<1x1xf32> to vector<1x256xf32>
    %190 = arith.addf %187, %189 : vector<1x256xf32>
    %191 = arith.addf %190, %3 : vector<1x256xf32>
    %c0_53 = arith.constant 0 : index
    %c0_54 = arith.constant 0 : index
    %c0_55 = arith.constant 0 : index
    %192 = vector.load %arg11[%c0_53, %c0_54, %c0_55] : memref<1x1x256xf32, #tpu.memory_space<vmem>>, vector<1x1x256xf32>
    %193 = vector.shape_cast %192 : vector<1x1x256xf32> to vector<1x256xf32>
    %194 = vector.shape_cast %191 : vector<1x256xf32> to vector<1x1x256xf32>
    tpu.vector_store %arg11[%c0_53, %c0_54, %c0_55], %194 {strides = array<i32>} : memref<1x1x256xf32, #tpu.memory_space<vmem>>, vector<1x1x256xf32>,
    return
  }
  func.func @transform_0(%arg0: i32) -> (i32, i32, i32) {
    %c0_i32 = arith.constant 0 : i32
    %c0_i32_0 = arith.constant 0 : i32
    %c0_i32_1 = arith.constant 0 : i32
    return %arg0, %c0_i32, %c0_i32_0 : i32, i32, i32
  }
  func.func @transform_1(%arg0: i32) -> (i32, i32, i32) {
    %c0_i32 = arith.constant 0 : i32
    %c0_i32_0 = arith.constant 0 : i32
    %c0_i32_1 = arith.constant 0 : i32
    return %arg0, %c0_i32, %c0_i32_0 : i32, i32, i32
  }
  func.func @transform_2(%arg0: i32) -> (i32, i32, i32) {
    %c0_i32 = arith.constant 0 : i32
    %c0_i32_0 = arith.constant 0 : i32
    %c0_i32_1 = arith.constant 0 : i32
    %c0_i32_2 = arith.constant 0 : i32
    return %c0_i32, %c0_i32_0, %c0_i32_1 : i32, i32, i32
  }
  func.func @transform_3(%arg0: i32) -> (i32, i32) {
    %c0_i32 = arith.constant 0 : i32
    %c0_i32_0 = arith.constant 0 : i32
    %c0_i32_1 = arith.constant 0 : i32
    return %c0_i32, %c0_i32_0 : i32, i32
  }
  func.func @transform_4(%arg0: i32) -> (i32, i32) {
    %c0_i32 = arith.constant 0 : i32
    %c0_i32_0 = arith.constant 0 : i32
    %c0_i32_1 = arith.constant 0 : i32
    return %c0_i32, %c0_i32_0 : i32, i32
  }
  func.func @transform_5(%arg0: i32) -> (i32, i32, i32) {
    %c0_i32 = arith.constant 0 : i32
    %c0_i32_0 = arith.constant 0 : i32
    %c0_i32_1 = arith.constant 0 : i32
    %c0_i32_2 = arith.constant 0 : i32
    return %c0_i32, %c0_i32_0, %c0_i32_1 : i32, i32, i32
  }
  func.func @transform_6(%arg0: i32) -> (i32, i32, i32) {
    %c0_i32 = arith.constant 0 : i32
    %c0_i32_0 = arith.constant 0 : i32
    %c0_i32_1 = arith.constant 0 : i32
    %c0_i32_2 = arith.constant 0 : i32
    return %c0_i32, %c0_i32_0, %c0_i32_1 : i32, i32, i32
  }
  func.func @transform_7(%arg0: i32) -> (i32, i32) {
    %c0_i32 = arith.constant 0 : i32
    %c0_i32_0 = arith.constant 0 : i32
    %c0_i32_1 = arith.constant 0 : i32
    return %c0_i32, %c0_i32_0 : i32, i32
  }
  func.func @transform_8(%arg0: i32) -> (i32, i32) {
    %c0_i32 = arith.constant 0 : i32
    %c0_i32_0 = arith.constant 0 : i32
    %c0_i32_1 = arith.constant 0 : i32
    return %c0_i32, %c0_i32_0 : i32, i32
  }
  func.func @transform_9(%arg0: i32) -> (i32, i32, i32) {
    %c0_i32 = arith.constant 0 : i32
    %c0_i32_0 = arith.constant 0 : i32
    %c0_i32_1 = arith.constant 0 : i32
    return %arg0, %c0_i32, %c0_i32_0 : i32, i32, i32
  }
  func.func @transform_10(%arg0: i32) -> (i32, i32, i32) {
    %c0_i32 = arith.constant 0 : i32
    %c0_i32_0 = arith.constant 0 : i32
    %c0_i32_1 = arith.constant 0 : i32
    return %arg0, %c0_i32, %c0_i32_0 : i32, i32, i32
  }
}

</mosaic_0001>

<bundles_post_ra>
// kernel: simple_attention_forward.1
= control target key start
LH: loop header
LB: loop body
LE: loop exit
PB: predicated region body
PF: predicated region fallthrough
CT: control target
= control target key end

     0   :  { %s1366_s15 = smov 0   ;;  %s1765_s0 = inlined_call_operand.vmem [shape: f32[2,4,256], index: 0, kind: input, shape index: {}]   ;;  %s1766_s1 = inlined_call_operand.vmem [shape: f32[2,1,256], index: 1, kind: input, shape index: {}]   ;;  %s1767_s2 = inlined_call_operand.vmem [shape: f32[9,1,256], index: 2, kind: input, shape index: {}]   ;;  %s1768_s3 = inlined_call_operand.vmem [shape: f32[8,4], index: 3, kind: input, shape index: {}]   ;;  %s1769_s4 = inlined_call_operand.vmem [shape: f32[8,1], index: 4, kind: input, shape index: {}]   ;;  %s1770_s5 = inlined_call_operand.vmem [shape: f32[3,8,72], index: 5, kind: input, shape index: {}]   ;;  %s1771_s6 = inlined_call_operand.vmem [shape: f32[3,8,1], index: 6, kind: input, shape index: {}]   ;;  %s1772_s7 = inlined_call_operand.vmem [shape: f32[8,1], index: 7, kind: input, shape index: {}]   ;;  %s1773_s8 = inlined_call_operand.<no memory space> [shape: f32[1,1], index: 8, kind: input, shape index: {}]   ;;  %s1774_s9 = inlined_call_operand.vmem [shape: f32[2,8,256], index: 9, kind: output, shape index: {0}]   ;;  %s1775_s10 = inlined_call_operand.vmem [shape: f32[2,1,256], index: 10, kind: output, shape index: {1}]  }
   0x1   :  { %v16_v0 = vstv %s1773_s8 }
   0x2   :  { %17 = vst [vmem:[#allocation2] sm:$0x1] %v16_v0 }
   0x3 LB: > { %s1239_s16 = sadd.s32 4294967295, %s1295_s15   ;;  %p1243_p0 = scmp.ge.s32.totalorder %s1295_s15, 1  ;;  %s1295_s15 = sphi %s1366_s15, %s23_s15  }
   0x4   : > { %p326_p1 = scmp.lt.s32.totalorder %s1295_s15, 3 }
   0x6   : > { %p327_p2 = pnand %p1243_p0, %p326_p1 }
   0x7   : > { %p372_p3 = scmp.lt.s32.totalorder (!%p327_p2), %s1239_s16, 1  ;;  %s1299_s28 = smov (!%p327_p2), 112  }
   0x8   : > { %330 = sbr.rel (%p327_p2) target bundleno = 1316 (0x524), region = 56  ;;  %s1300_s29 = smov (!%p327_p2), 111  }
   0x9   : > { %s1301_s30 = smov (!%p327_p2), 113   ;;  %s1302_s11 = smov (!%p327_p2), 127  }
   0xa   : > { %s1303_s12 = smov (!%p327_p2), 1   ;;  %s1304_s13 = smov (!%p327_p2), 15  }
   0xb   : > { %s1305_s14 = smov (!%p327_p2), 16   ;;  %s1306_s17 = smov (!%p327_p2), 17  }
   0xd   : > { %v415_v1 = vld [vmem:[%s1769_s4] sm:$0xff]  ;;  %v1297_v2 = vmov 0.0   ;;  %s1777_s16 = smov (!%p372_p3, %s1239_s16), 1  ;;  %v1298_v3 = vmov 0   ;;  %v399_v8 = vlaneseq  ;;  %vm425_vm0 = vcmask 1043456  }
   0xe   : > { %496 = vmatprep.mubr.f32.mxu0 %v1297_v2  ;;  %764 = vmatprep.mubr.f32.mxu1 %v1297_v2  ;;  %s1246_s8 = sshll.u32 %s1777_s16, 1  ;;  %s1261_s22 = sshll.u32 %s1777_s16, 3  ;;  %v414_v19 = vld [vmem:[%s1768_s3] sm:$0xff]  ;;  %vm421_vm1 = vcmask 31744   ;;  %v511_v31 = vld [vmem:[%s1767_s2 + $0x10] sm:$0x3] }
   0xf   : > { %1282 = vset.pattern.permute.xlu0 %v1298_v3  ;;  %1283 = vset.pattern.permute.xlu1 %v1298_v3  ;;  %s380_s21 = scalar_lea.vmem %s1766_s1, %s1246_s8  ;;  %s376_s25 = scalar_lea.vmem %s1765_s0, %s1261_s22  ;;  %v1395_v9 = vshrl.u32 %v399_v8, 7  ;;  %v512_v25 = vld [vmem:[%s1771_s6] sm:$0xff]  ;;  %v1449_v30 = vand.u32 127, %v399_v8  ;;  %v510_v34 = vld [vmem:[%s1767_s2 + $0xe] sm:$0x3]  ;;  %vm696_vm10 = vcmask 588800  }
  0x10   : > { %418 = vperm.xlu0 %1282, %v415_v1   ;;  %v1387_v4 = vld [vmem:[%s380_s21] sm:$0x3]  ;;  %v509_v35 = vld [vmem:[%s1767_s2 + $0xc] sm:$0x3]  ;;  %v508_v45 = vld [vmem:[%s1767_s2 + $0xa] sm:$0x3]  ;;  %s389_s18 = scalar_lea.vmem %s1775_s10, %s1246_s8 }
  0x11   : > { %v1250_v5 = vmul.f32 -1.442695, %v1387_v4  ;;  %v390_v10 = vld [vmem:[%s376_s25] sm:$0xff]  ;;  %v1398_v11 = vsub.s32 0, %v1395_v9  ;;  %v1401_v12 = vsub.s32 1, %v1395_v9  ;;  %vm654_vm2 = vcmp.lt.s32.totalorder %v1449_v30, 112 }
  0x12   : > { %v410_v13 = vcombine.high %v390_v10, %v390_v10  ;;  %vm674_vm3 = vcmp.lt.s32.totalorder %v1449_v30, 111  ;;  %vm634_vm4 = vcmp.lt.s32.totalorder %v1449_v30, 113  ;;  %vm614_vm5 = vcmp.lt.s32.totalorder %v1449_v30, 127  ;;  %v507_v57 = vld [vmem:[%s1767_s2 + $0x8] sm:$0x3] }
  0x13   : > { %1285 = vpow2.f32 %v1250_v5  ;;  %v1463_v36 = vrot.slane %v511_v31, %v1401_v12  ;;  %v1466_v37 = vrot.slane %v511_v31, %v1398_v11  ;;  %v1469_v38 = vrot.slane %v510_v34, %v1398_v11  ;;  %v506_v61 = vld [vmem:[%s1767_s2 + $0x6] sm:$0x3]  ;;  %v505_v3 = vld [vmem:[%s1767_s2 + $0x4] sm:$0x3] }
  0x14   : > { %v1472_v39 = vrot.slane %v510_v34, %v1401_v12  ;;  %v1478_v43 = vrot.slane %v509_v35, %v1401_v12  ;;  %v1493_v50 = vrot.slane %v509_v35, %v1398_v11  ;;  %v1501_v54 = vrot.slane %v508_v45, %v1401_v12 }
  0x15   : > { %v1508_v59 = vrot.slane %v508_v45, %v1398_v11  ;;  %vm581_vm6 = vcmp.lt.s32.totalorder %v1449_v30, 1  ;;  %v1520_v0 = vrot.slane %v507_v57, %v1401_v12  ;;  %v1527_v5 = vrot.slane %v507_v57, %v1398_v11 }
  0x16   : > { %vm561_vm7 = vcmp.lt.s32.totalorder %v1449_v30, 15  ;;  %vm541_vm8 = vcmp.lt.s32.totalorder %v1449_v30, 16  ;;  %vm521_vm9 = vcmp.lt.s32.totalorder %v1449_v30, 17  ;;  %vm1138_vm11 = vcmp.lt.s32.totalorder %v399_v8, 256 }
  0x20   : > { %v1286_v6 = vpop.eup %1285 }
  0x21   : > { %v395_v7 = vadd.f32 1.0, %v1286_v6 }
  0x23   : > { %1287 = vrcp.f32 %v395_v7  ;;  %v1531_v7 = vrot.slane %v506_v61, %v1401_v12 }
  0x30   : > { %v1288_v14 = vpop.eup %1287 }
  0x31   : > { %v406_v15 = vrot.slane %v1288_v14, %v1401_v12  ;;  %v402_v16 = vrot.slane %v1288_v14, %v1398_v11 }
  0x33   : > { %v413_v17 = vmul.f32 %v410_v13, %v406_v15  ;;  %v412_v18 = vmul.f32 %v402_v16, %v390_v10  ;;  %v1536_v15 = vrot.slane %v506_v61, %v1398_v11 }
  0x35   : > { %1251 = vmatprep.subr.msk.mxu0 %vm425_vm0, %v413_v17  ;;  %v504_v17 = vld [vmem:[%s1767_s2 + $0x2] sm:$0x3] }
  0x36   : > { %1252 = vmatpush1.msk.msra.mxu0 %vm425_vm0, %v412_v18 }
  0x37   : > { %1253 = vmatmul.mubr.msk.f32.vlgmr.msra.gmra.mxu0 %vm421_vm1, %v414_v19  ;;  %v1546_v19 = vrot.slane %v505_v3, %v1401_v12 }
  0x38   : > { %913 = vmatprep.mubr.f32.mxu0 %v1297_v2 }
  0x8b   : > { %v419_v20 = vpop.permute.xlu0 %418 }
  0xf7   : > { %v498_v21 = vpop.f32.mrf.mxu0 }
  0xf8   : > { %v1409_v22 = vadd.f32 %v498_v21, %v419_v20  ;;  %v1552_v21 = vrot.slane %v505_v3, %v1398_v11 }
  0xf9   : > { %v500_v23 = vpop.f32.mrf.mxu0 }
  0xfa   : > { %650 = vrot.lane.b32.xlu1 %v1409_v22, %s1299_s28  ;;  %670 = vrot.lane.b32.xlu0 %v1409_v22, %s1300_s29  ;;  %v1415_v24 = vadd.f32 %v500_v23, %v419_v20 }
  0xfc   : > { %v609_v20 = vmul.f32 %v1520_v0, %v1415_v24 }
  0xfe   : > { %630 = vrot.lane.b32.xlu1 %v1409_v22, %s1301_s30  ;;  %652 = vrot.lane.b32.xlu0 %v1415_v24, %s1299_s28 }
 0x102   : > { %610 = vrot.lane.b32.xlu1 %v1409_v22, %s1302_s11  ;;  %632 = vrot.lane.b32.xlu0 %v1415_v24, %s1301_s30 }
 0x106   : > { %672 = vrot.lane.b32.xlu1 %v1415_v24, %s1300_s29  ;;  %612 = vrot.lane.b32.xlu0 %v1415_v24, %s1302_s11 }
 0x10a   : > { %577 = vrot.lane.b32.xlu1 %v1409_v22, %s1303_s12  ;;  %579 = vrot.lane.b32.xlu0 %v1415_v24, %s1303_s12 }
 0x10e   : > { %557 = vrot.lane.b32.xlu1 %v1409_v22, %s1304_s13  ;;  %559 = vrot.lane.b32.xlu0 %v1415_v24, %s1304_s13 }
 0x112   : > { %537 = vrot.lane.b32.xlu1 %v1409_v22, %s1305_s14  ;;  %539 = vrot.lane.b32.xlu0 %v1415_v24, %s1305_s14 }
 0x116   : > { %515 = vrot.lane.b32.xlu1 %v1409_v22, %s1306_s17  ;;  %517 = vrot.lane.b32.xlu0 %v1415_v24, %s1306_s17 }
 0x11a   : > { %693 = vperm.xlu1 %1283, %v512_v25   ;;  %v608_v25 = vmul.f32 %v1527_v5, %v1409_v22 }
 0x16c   : > { %v651_v26 = vpop.permute.xlu1 %650  ;;  %v671_v27 = vpop.permute.xlu0 %670 }
 0x170   : > { %v631_v28 = vpop.permute.xlu1 %630  ;;  %v653_v29 = vpop.permute.xlu0 %652 }
 0x171   : > { %v656_v42 = vsel %vm654_vm2, %v653_v29, %v651_v26  ;;  %v655_v47 = vsel %vm654_vm2, %v651_v26, %v653_v29  ;;  %v503_v26 = vld [vmem:[%s1767_s2] sm:$0x3]  ;;  %v1565_v29 = vrot.slane %v504_v17, %v1401_v12 }
 0x172   : > { %v669_v52 = vmul.f32 %v1472_v39, %v656_v42  ;;  %v668_v58 = vmul.f32 %v1469_v38, %v655_v47 }
 0x174   : > { %v611_v32 = vpop.permute.xlu1 %610  ;;  %v633_v33 = vpop.permute.xlu0 %632 }
 0x175   : > { %v636_v51 = vsel %vm634_vm4, %v633_v33, %v631_v28  ;;  %v635_v53 = vsel %vm634_vm4, %v631_v28, %v633_v33  ;;  %v1569_v33 = vrot.slane %v504_v17, %v1398_v11 }
 0x176   : > { %v649_v62 = vmul.f32 %v1478_v43, %v636_v51  ;;  %v648_v1 = vmul.f32 %v1493_v50, %v635_v53  ;;  %v690_v53 = vld [vmem:[%s1770_s5] sm:$0xff] }
 0x178   : > { %v673_v40 = vpop.permute.xlu1 %672  ;;  %v613_v41 = vpop.permute.xlu0 %612 }
 0x179   : > { %v675_v44 = vsel %vm674_vm3, %v671_v27, %v673_v40  ;;  %v676_v46 = vsel %vm674_vm3, %v673_v40, %v671_v27  ;;  %v616_v60 = vsel %vm614_vm5, %v613_v41, %v611_v32  ;;  %v615_v63 = vsel %vm614_vm5, %v611_v32, %v613_v41 }
 0x17a   : > { %v689_v48 = vmul.f32 %v1463_v36, %v676_v46  ;;  %v688_v49 = vmul.f32 %v1466_v37, %v675_v44  ;;  %v629_v6 = vmul.f32 %v1501_v54, %v616_v60  ;;  %v628_v14 = vmul.f32 %v1508_v59, %v615_v63 }
 0x17b   : > { %v1578_v40 = vrot.slane %v503_v26, %v1398_v11  ;;  %v1581_v41 = vrot.slane %v503_v26, %v1401_v12 }
 0x17c   : > { %v578_v55 = vpop.permute.xlu1 %577  ;;  %714 = vmatprep.subr.mxu1 %v689_v48  ;;  %v580_v56 = vpop.permute.xlu0 %579 }
 0x17d   : > { %715 = vmatpush1.msra.mxu1 %v688_v49  ;;  %v582_v16 = vsel %vm581_vm6, %v578_v55, %v580_v56  ;;  %v583_v18 = vsel %vm581_vm6, %v580_v56, %v578_v55 }
 0x17e   : > { %716 = vmatprep.subr.mxu1 %v669_v52  ;;  %v596_v27 = vmul.f32 %v1531_v7, %v582_v16  ;;  %v595_v32 = vmul.f32 %v1536_v15, %v583_v18 }
 0x17f   : > { %717 = vmatpush1.msra.mxu1 %v668_v58 }
 0x180   : > { %v558_v10 = vpop.permute.xlu1 %557  ;;  %718 = vmatprep.subr.mxu1 %v649_v62  ;;  %v560_v13 = vpop.permute.xlu0 %559 }
 0x181   : > { %719 = vmatpush1.msra.mxu1 %v648_v1  ;;  %v562_v23 = vsel %vm561_vm7, %v558_v10, %v560_v13  ;;  %v563_v24 = vsel %vm561_vm7, %v560_v13, %v558_v10 }
 0x182   : > { %720 = vmatprep.subr.mxu1 %v629_v6  ;;  %v576_v34 = vmul.f32 %v1546_v19, %v562_v23  ;;  %v575_v42 = vmul.f32 %v1552_v21, %v563_v24 }
 0x183   : > { %721 = vmatpush1.msra.mxu1 %v628_v14 }
 0x184   : > { %v538_v28 = vpop.permute.xlu1 %537  ;;  %722 = vmatprep.subr.mxu1 %v609_v20  ;;  %v540_v31 = vpop.permute.xlu0 %539 }
 0x185   : > { %v542_v22 = vsel %vm541_vm8, %v538_v28, %v540_v31  ;;  %723 = vmatpush1.msra.mxu1 %v608_v25  ;;  %v543_v35 = vsel %vm541_vm8, %v540_v31, %v538_v28 }
 0x186   : > { %724 = vmatprep.subr.mxu1 %v596_v27  ;;  %v556_v44 = vmul.f32 %v1565_v29, %v542_v22  ;;  %v555_v47 = vmul.f32 %v1569_v33, %v543_v35 }
 0x187   : > { %725 = vmatpush1.msra.mxu1 %v595_v32 }
 0x188   : > { %v516_v45 = vpop.permute.xlu1 %515  ;;  %v518_v46 = vpop.permute.xlu0 %517  ;;  %726 = vmatprep.subr.mxu1 %v576_v34 }
 0x189   : > { %v522_v48 = vsel %vm521_vm9, %v516_v45, %v518_v46  ;;  %v523_v49 = vsel %vm521_vm9, %v518_v46, %v516_v45  ;;  %727 = vmatpush1.msra.mxu1 %v575_v42 }
 0x18a   : > { %v535_v51 = vmul.f32 %v1578_v40, %v523_v49  ;;  %v536_v52 = vmul.f32 %v1581_v41, %v522_v48  ;;  %728 = vmatprep.subr.mxu1 %v556_v44 }
 0x18b   : > { %729 = vmatpush1.msra.mxu1 %v555_v47 }
 0x18c   : > { %730 = vmatprep.subr.mxu1 %v536_v52 }
 0x18d   : > { %731 = vmatpush1.msra.mxu1 %v535_v51 }
 0x18e   : > { %1254 = vmatmul.mubr.msk.f32.vlgmr.msra.gmra.mxu1 %vm696_vm10, %v690_v53 }
 0x18f   : > { %1062 = vmatprep.mubr.f32.mxu1 %v1297_v2  ;;  %v513_v2 = vld [vmem:[%s1771_s6 + $0x8] sm:$0xff] }
 0x195   : > { %v694_v55 = vpop.permute.xlu1 %693 }
 0x24e   : > { %v766_v56 = vpop.f32.mrf.mxu1 }
 0x24f   : > { %v767_v57 = vadd.f32 %v766_v56, %v694_v55 }
 0x250   : > { %v768_v58 = vpop.f32.mrf.mxu1 }
 0x251   : > { %v771_v60 = vmax.f32 %v767_v57, 0.0  ;;  %v769_v61 = vadd.f32 %v768_v58, %v694_v55 }
 0x253   : > { %v772_v62 = vmax.f32 %v769_v61, 0.0  ;;  %831 = vrot.lane.b32.xlu0 %v771_v60, %s1300_s29  ;;  %v805_v51 = vmul.f32 %v771_v60, %v1527_v5 }
 0x255   : > { %833 = vrot.lane.b32.xlu1 %v772_v62, %s1300_s29  ;;  %v806_v47 = vmul.f32 %v772_v62, %v1520_v0 }
 0x257   : > { %823 = vrot.lane.b32.xlu0 %v771_v60, %s1299_s28 }
 0x259   : > { %825 = vrot.lane.b32.xlu1 %v772_v62, %s1299_s28 }
 0x25b   : > { %815 = vrot.lane.b32.xlu0 %v771_v60, %s1301_s30 }
 0x25d   : > { %817 = vrot.lane.b32.xlu1 %v772_v62, %s1301_s30 }
 0x25f   : > { %807 = vrot.lane.b32.xlu0 %v771_v60, %s1302_s11 }
 0x261   : > { %809 = vrot.lane.b32.xlu1 %v772_v62, %s1302_s11 }
 0x263   : > { %797 = vrot.lane.b32.xlu0 %v771_v60, %s1303_s12 }
 0x265   : > { %799 = vrot.lane.b32.xlu1 %v772_v62, %s1303_s12 }
 0x267   : > { %789 = vrot.lane.b32.xlu0 %v771_v60, %s1304_s13 }
 0x269   : > { %791 = vrot.lane.b32.xlu1 %v772_v62, %s1304_s13 }
 0x26b   : > { %781 = vrot.lane.b32.xlu0 %v771_v60, %s1305_s14 }
 0x26d   : > { %783 = vrot.lane.b32.xlu1 %v772_v62, %s1305_s14 }
 0x26f   : > { %773 = vrot.lane.b32.xlu0 %v771_v60, %s1306_s17 }
 0x271   : > { %775 = vrot.lane.b32.xlu1 %v772_v62, %s1306_s17 }
 0x273   : > { %843 = vperm.xlu0 %1282, %v513_v2  }
 0x2c5   : > { %v832_v63 = vpop.permute.xlu0 %831 }
 0x2c7   : > { %v834_v1 = vpop.permute.xlu1 %833 }
 0x2c8   : > { %v835_v3 = vsel %vm674_vm3, %v832_v63, %v834_v1  ;;  %v836_v6 = vsel %vm674_vm3, %v834_v1, %v832_v63 }
 0x2c9   : > { %v837_v10 = vmul.f32 %v835_v3, %v1466_v37  ;;  %v838_v13 = vmul.f32 %v836_v6, %v1463_v36  ;;  %v824_v14 = vpop.permute.xlu0 %823 }
 0x2cb   : > { %v826_v16 = vpop.permute.xlu1 %825  ;;  %863 = vmatprep.subr.mxu0 %v838_v13 }
 0x2cc   : > { %v827_v17 = vsel %vm654_vm2, %v824_v14, %v826_v16  ;;  %v828_v18 = vsel %vm654_vm2, %v826_v16, %v824_v14  ;;  %864 = vmatpush1.msra.mxu0 %v837_v10 }
 0x2cd   : > { %v829_v20 = vmul.f32 %v827_v17, %v1469_v38  ;;  %v830_v23 = vmul.f32 %v828_v18, %v1472_v39  ;;  %v816_v25 = vpop.permute.xlu0 %815 }
 0x2cf   : > { %v818_v26 = vpop.permute.xlu1 %817  ;;  %865 = vmatprep.subr.mxu0 %v830_v23 }
 0x2d0   : > { %v819_v27 = vsel %vm634_vm4, %v816_v25, %v818_v26  ;;  %v820_v24 = vsel %vm634_vm4, %v818_v26, %v816_v25  ;;  %866 = vmatpush1.msra.mxu0 %v829_v20  ;;  %v1255_v20 = vld [vmem:[%s1770_s5 + $0x8] sm:$0xff] }
 0x2d1   : > { %v821_v28 = vmul.f32 %v819_v27, %v1493_v50  ;;  %v822_v31 = vmul.f32 %v820_v24, %v1478_v43  ;;  %v808_v32 = vpop.permute.xlu0 %807 }
 0x2d3   : > { %v810_v22 = vpop.permute.xlu1 %809  ;;  %867 = vmatprep.subr.mxu0 %v822_v31 }
 0x2d4   : > { %v811_v34 = vsel %vm614_vm5, %v808_v32, %v810_v22  ;;  %v812_v35 = vsel %vm614_vm5, %v810_v22, %v808_v32  ;;  %868 = vmatpush1.msra.mxu0 %v821_v28  ;;  %v514_v32 = vld [vmem:[%s1771_s6 + $0x10] sm:$0xff]  ;;  %v1073_v22 = vld [vmem:[%s1772_s7] sm:$0xff] }
 0x2d5   : > { %v813_v42 = vmul.f32 %v811_v34, %v1508_v59  ;;  %v814_v44 = vmul.f32 %v812_v35, %v1501_v54  ;;  %v798_v45 = vpop.permute.xlu0 %797  ;;  %v1093_v34 = vld [vmem:[#allocation2] sm:$0x1] }
 0x2d7   : > { %v800_v46 = vpop.permute.xlu1 %799  ;;  %869 = vmatprep.subr.mxu0 %v814_v44 }
 0x2d8   : > { %v801_v48 = vsel %vm581_vm6, %v798_v45, %v800_v46  ;;  %v802_v49 = vsel %vm581_vm6, %v800_v46, %v798_v45  ;;  %870 = vmatpush1.msra.mxu0 %v813_v42 }
 0x2d9   : > { %v803_v52 = vmul.f32 %v802_v49, %v1536_v15  ;;  %v804_v53 = vmul.f32 %v801_v48, %v1531_v7  ;;  %871 = vmatprep.subr.mxu0 %v806_v47  ;;  %v790_v55 = vpop.permute.xlu0 %789 }
 0x2da   : > { %872 = vmatpush1.msra.mxu0 %v805_v51 }
 0x2db   : > { %v792_v56 = vpop.permute.xlu1 %791  ;;  %873 = vmatprep.subr.mxu0 %v804_v53 }
 0x2dc   : > { %v793_v57 = vsel %vm561_vm7, %v790_v55, %v792_v56  ;;  %v794_v58 = vsel %vm561_vm7, %v792_v56, %v790_v55  ;;  %874 = vmatpush1.msra.mxu0 %v803_v52 }
 0x2dd   : > { %v795_v61 = vmul.f32 %v794_v58, %v1552_v21  ;;  %v796_v60 = vmul.f32 %v793_v57, %v1546_v19  ;;  %v782_v62 = vpop.permute.xlu0 %781 }
 0x2df   : > { %v784_v2 = vpop.permute.xlu1 %783  ;;  %875 = vmatprep.subr.mxu0 %v796_v60 }
 0x2e0   : > { %v785_v63 = vsel %vm541_vm8, %v782_v62, %v784_v2  ;;  %v786_v1 = vsel %vm541_vm8, %v784_v2, %v782_v62  ;;  %876 = vmatpush1.msra.mxu0 %v795_v61 }
 0x2e1   : > { %v787_v3 = vmul.f32 %v786_v1, %v1569_v33  ;;  %v788_v6 = vmul.f32 %v785_v63, %v1565_v29  ;;  %v774_v10 = vpop.permute.xlu0 %773 }
 0x2e3   : > { %v776_v13 = vpop.permute.xlu1 %775  ;;  %877 = vmatprep.subr.mxu0 %v788_v6 }
 0x2e4   : > { %v777_v14 = vsel %vm521_vm9, %v774_v10, %v776_v13  ;;  %v778_v16 = vsel %vm521_vm9, %v776_v13, %v774_v10  ;;  %878 = vmatpush1.msra.mxu0 %v787_v3 }
 0x2e5   : > { %v779_v17 = vmul.f32 %v778_v16, %v1578_v40  ;;  %v780_v18 = vmul.f32 %v777_v14, %v1581_v41 }
 0x2e7   : > { %879 = vmatprep.subr.mxu0 %v780_v18 }
 0x2e8   : > { %880 = vmatpush1.msra.mxu0 %v779_v17 }
 0x2e9   : > { %1256 = vmatmul.mubr.msk.f32.vlgmr.msra.gmra.mxu0 %vm696_vm10, %v1255_v20 }
 0x2ee   : > { %v844_v23 = vpop.permute.xlu0 %843 }
 0x3a9   : > { %v915_v25 = vpop.f32.mrf.mxu0 }
 0x3aa   : > { %v916_v26 = vadd.f32 %v915_v25, %v844_v23 }
 0x3ab   : > { %v917_v27 = vpop.f32.mrf.mxu0 }
 0x3ac   : > { %v920_v24 = vmax.f32 %v916_v26, 0.0  ;;  %v918_v28 = vadd.f32 %v917_v27, %v844_v23 }
 0x3ae   : > { %v921_v31 = vmax.f32 %v918_v28, 0.0  ;;  %980 = vrot.lane.b32.xlu1 %v920_v24, %s1300_s29  ;;  %v954_v10 = vmul.f32 %v920_v24, %v1527_v5 }
 0x3b0   : > { %982 = vrot.lane.b32.xlu0 %v921_v31, %s1300_s29 }
 0x3b2   : > { %972 = vrot.lane.b32.xlu1 %v920_v24, %s1299_s28 }
 0x3b4   : > { %974 = vrot.lane.b32.xlu0 %v921_v31, %s1299_s28 }
 0x3b6   : > { %964 = vrot.lane.b32.xlu1 %v920_v24, %s1301_s30 }
 0x3b8   : > { %966 = vrot.lane.b32.xlu0 %v921_v31, %s1301_s30 }
 0x3ba   : > { %956 = vrot.lane.b32.xlu1 %v920_v24, %s1302_s11 }
 0x3bc   : > { %958 = vrot.lane.b32.xlu0 %v921_v31, %s1302_s11 }
 0x3be   : > { %946 = vrot.lane.b32.xlu1 %v920_v24, %s1303_s12 }
 0x3c0   : > { %948 = vrot.lane.b32.xlu0 %v921_v31, %s1303_s12 }
 0x3c2   : > { %938 = vrot.lane.b32.xlu1 %v920_v24, %s1304_s13 }
 0x3c4   : > { %940 = vrot.lane.b32.xlu0 %v921_v31, %s1304_s13 }
 0x3c6   : > { %930 = vrot.lane.b32.xlu1 %v920_v24, %s1305_s14 }
 0x3c8   : > { %932 = vrot.lane.b32.xlu0 %v921_v31, %s1305_s14  ;;  %s1262_s14 = sshll.u32 %s1777_s16, 4 }
 0x3c9   : > { %s385_s25 = scalar_lea.vmem %s1774_s9, %s1262_s14 }
 0x3ca   : > { %922 = vrot.lane.b32.xlu1 %v920_v24, %s1306_s17 }
 0x3cc   : > { %924 = vrot.lane.b32.xlu0 %v921_v31, %s1306_s17 }
 0x3ce   : > { %992 = vperm.xlu1 %1283, %v514_v32  }
 0x3d0   : > { %1076 = vperm.xlu0 %1282, %v1073_v22  }
 0x3d2   : > { %1096 = vperm.xlu1 %1283, %v1093_v34  }
 0x420   : > { %v981_v35 = vpop.permute.xlu1 %980 }
 0x422   : > { %v983_v42 = vpop.permute.xlu0 %982 }
 0x423   : > { %v984_v44 = vsel %vm674_vm3, %v981_v35, %v983_v42  ;;  %v985_v45 = vsel %vm674_vm3, %v983_v42, %v981_v35 }
 0x424   : > { %v986_v46 = vmul.f32 %v984_v44, %v1466_v37  ;;  %v987_v47 = vmul.f32 %v985_v45, %v1463_v36  ;;  %v973_v48 = vpop.permute.xlu1 %972 }
 0x426   : > { %v975_v49 = vpop.permute.xlu0 %974  ;;  %1012 = vmatprep.subr.mxu1 %v987_v47 }
 0x427   : > { %v976_v51 = vsel %vm654_vm2, %v973_v48, %v975_v49  ;;  %v977_v52 = vsel %vm654_vm2, %v975_v49, %v973_v48  ;;  %1013 = vmatpush1.msra.mxu1 %v986_v46 }
 0x428   : > { %v978_v53 = vmul.f32 %v976_v51, %v1469_v38  ;;  %v979_v55 = vmul.f32 %v977_v52, %v1472_v39  ;;  %v965_v56 = vpop.permute.xlu1 %964 }
 0x42a   : > { %v967_v57 = vpop.permute.xlu0 %966  ;;  %1014 = vmatprep.subr.mxu1 %v979_v55 }
 0x42b   : > { %v968_v36 = vsel %vm634_vm4, %v965_v56, %v967_v57  ;;  %v969_v37 = vsel %vm634_vm4, %v967_v57, %v965_v56  ;;  %1015 = vmatpush1.msra.mxu1 %v978_v53  ;;  %v1307_v56 = vmov 1966171168  }
 0x42c   : > { %v970_v58 = vmul.f32 %v968_v36, %v1493_v50  ;;  %v971_v61 = vmul.f32 %v969_v37, %v1478_v43  ;;  %v957_v60 = vpop.permute.xlu1 %956  ;;  %v955_v50 = vmul.f32 %v921_v31, %v1520_v0  ;;  %v1122_v57 = vunpack.c.l.s4 %v1307_v56 }
 0x42e   : > { %v959_v62 = vpop.permute.xlu0 %958  ;;  %1016 = vmatprep.subr.mxu1 %v971_v61  ;;  %v1109_v61 = vrot.slane %v1387_v4, %v1398_v11 }
 0x42f   : > { %v960_v38 = vsel %vm614_vm5, %v957_v60, %v959_v62  ;;  %v961_v39 = vsel %vm614_vm5, %v959_v62, %v957_v60  ;;  %1017 = vmatpush1.msra.mxu1 %v970_v58 }
 0x430   : > { %v962_v2 = vmul.f32 %v960_v38, %v1508_v59  ;;  %v963_v63 = vmul.f32 %v961_v39, %v1501_v54  ;;  %v947_v1 = vpop.permute.xlu1 %946  ;;  %v1113_v38 = vrot.slane %v1387_v4, %v1401_v12  ;;  %v1123_v39 = vunpack.c.0.s8 %v1122_v57 }
 0x432   : > { %v949_v3 = vpop.permute.xlu0 %948  ;;  %1018 = vmatprep.subr.mxu1 %v963_v63 }
 0x433   : > { %v950_v43 = vsel %vm581_vm6, %v947_v1, %v949_v3  ;;  %v951_v6 = vsel %vm581_vm6, %v949_v3, %v947_v1  ;;  %1019 = vmatpush1.msra.mxu1 %v962_v2  ;;  %v1126_v3 = vsub.s32 %v1123_v39, %v1395_v9 }
 0x434   : > { %v952_v13 = vmul.f32 %v951_v6, %v1536_v15  ;;  %v953_v59 = vmul.f32 %v950_v43, %v1531_v7  ;;  %1020 = vmatprep.subr.mxu1 %v955_v50  ;;  %v939_v54 = vpop.permute.xlu1 %938 }
 0x435   : > { %1021 = vmatpush1.msra.mxu1 %v954_v10 }
 0x436   : > { %v941_v14 = vpop.permute.xlu0 %940  ;;  %1022 = vmatprep.subr.mxu1 %v953_v59 }
 0x437   : > { %v942_v0 = vsel %vm561_vm7, %v939_v54, %v941_v14  ;;  %v943_v16 = vsel %vm561_vm7, %v941_v14, %v939_v54  ;;  %1023 = vmatpush1.msra.mxu1 %v952_v13 }
 0x438   : > { %v944_v17 = vmul.f32 %v943_v16, %v1552_v21  ;;  %v945_v5 = vmul.f32 %v942_v0, %v1546_v19  ;;  %v931_v18 = vpop.permute.xlu1 %930 }
 0x43a   : > { %v933_v15 = vpop.permute.xlu0 %932  ;;  %1024 = vmatprep.subr.mxu1 %v945_v5 }
 0x43b   : > { %v934_v7 = vsel %vm541_vm8, %v931_v18, %v933_v15  ;;  %v935_v20 = vsel %vm541_vm8, %v933_v15, %v931_v18  ;;  %1025 = vmatpush1.msra.mxu1 %v944_v17 }
 0x43c   : > { %v936_v23 = vmul.f32 %v935_v20, %v1569_v33  ;;  %v937_v25 = vmul.f32 %v934_v7, %v1565_v29  ;;  %v923_v26 = vpop.permute.xlu1 %922  ;;  %v1257_v33 = vld [vmem:[%s1770_s5 + $0x10] sm:$0xff] }
 0x43e   : > { %v925_v27 = vpop.permute.xlu0 %924  ;;  %1026 = vmatprep.subr.mxu1 %v937_v25 }
 0x43f   : > { %v926_v19 = vsel %vm521_vm9, %v923_v26, %v925_v27  ;;  %v927_v21 = vsel %vm521_vm9, %v925_v27, %v923_v26  ;;  %1027 = vmatpush1.msra.mxu1 %v936_v23 }
 0x440   : > { %v928_v24 = vmul.f32 %v927_v21, %v1578_v40  ;;  %v929_v28 = vmul.f32 %v926_v19, %v1581_v41 }
 0x442   : > { %1028 = vmatprep.subr.mxu1 %v929_v28 }
 0x443   : > { %1029 = vmatpush1.msra.mxu1 %v928_v24 }
 0x444   : > { %1258 = vmatmul.mubr.msk.f32.vlgmr.msra.gmra.mxu1 %vm696_vm10, %v1257_v33 }
 0x449   : > { %v993_v29 = vpop.permute.xlu1 %992 }
 0x44b   : > { %v1077_v41 = vpop.permute.xlu0 %1076 }
 0x44d   : > { %v1097_v52 = vpop.permute.xlu1 %1096 }
 0x44e   : > { %v1102_v36 = vrot.slane %v1097_v52, %v1398_v11 }
 0x504   : > { %v1064_v31 = vpop.f32.mrf.mxu1 }
 0x505   : > { %v1065_v32 = vadd.f32 %v1064_v31, %v993_v29 }
 0x506   : > { %v1066_v30 = vpop.f32.mrf.mxu1 }
 0x507   : > { %v1069_v40 = vmax.f32 %v1065_v32, 0.0  ;;  %v1067_v22 = vadd.f32 %v1066_v30, %v993_v29 }
 0x509   : > { %1071 = vst [vmem:[%s385_s25] sm:$0xff] %v1069_v40  ;;  %v1079_v34 = vmul.f32 %v1077_v41, %v1069_v40  ;;  %v1070_v35 = vmax.f32 %v1067_v22, 0.0 }
 0x50b   : > { %v1081_v42 = vrot.slane %v1079_v34, 4  ;;  %1072 = vst [vmem:[%s385_s25 + $0x8] sm:$0xff] %v1070_v35  ;;  %v1080_v44 = vmul.f32 %v1077_v41, %v1070_v35 }
 0x50d   : > { %v1082_v45 = vadd.f32 %v1081_v42, %v1079_v34  ;;  %v1087_v46 = vrot.slane %v1080_v44, 4 }
 0x50f   : > { %v1083_v47 = vrot.slane %v1082_v45, 2  ;;  %v1088_v48 = vadd.f32 %v1087_v46, %v1080_v44 }
 0x511   : > { %v1084_v49 = vadd.f32 %v1083_v47, %v1082_v45  ;;  %v1089_v51 = vrot.slane %v1088_v48, 2 }
 0x513   : > { %v1085_v53 = vrot.slane %v1084_v49, 1  ;;  %v1090_v55 = vadd.f32 %v1089_v51, %v1088_v48 }
 0x515   : > { %v1086_v37 = vadd.f32 %v1085_v53, %v1084_v49  ;;  %v1091_v58 = vrot.slane %v1090_v55, 1 }
 0x517   : > { %v1103_v60 = vadd.f32 %v1102_v36, %v1086_v37  ;;  %v1092_v62 = vadd.f32 %v1091_v58, %v1090_v55 }
 0x519   : > { %v1104_v2 = vadd.f32 %v1102_v36, %v1092_v62  ;;  %v1116_v63 = vadd.f32 %v1109_v61, %v1103_v60 }
 0x51b   : > { %v1117_v1 = vadd.f32 %v1113_v38, %v1104_v2 }
 0x51d   : > { %v1120_v50 = vcombine.low %v1116_v63, %v1117_v1 }
 0x51f   : > { %v1127_v43 = vrot.slane %v1120_v50, %v1126_v3 }
 0x521   : > { %v1134_v11 = vrot.slane %v1127_v43, %v1126_v3 }
 0x523   : > { %1140 = vst.msk [vmem:[%s389_s18] sm:$0x3] %vm1138_vm11, %v1134_v11 }
 0x524 PF: > { %s23_s15 = sadd.s32 1, %s1295_s15  }
 0x525   : > { %p20_p4 = scmp.ge.s32.totalorder %s23_s15, 4  }
 0x527   :  { %22 = sbr.rel (!%p20_p4) target bundleno = 3 (0x3), region = 103 }

</bundles_post_ra>
